<compile_context>
chip_gen: v6e
topology: v6e:2x2x1
jax: 0.10.0
libtpu: 0.0.40
codegen_flags: <defaults>
</compile_context>

<pallas_src>
import jax
import jax.numpy as jnp
from jax.experimental import pallas as pl
from jax.experimental.pallas import tpu as pltpu


def _round_up(v, m):
    return (v + m - 1) // m * m


def voice_cnn_kernel(x_ref, wc_ref, bc_ref, wpg_ref, bpg_ref, out_ref):
    """One (TM, S) row tile -> (TM, Cp) highway output tile."""
    TM, S = x_ref.shape
    K, Cp = wc_ref.shape
    L = S - K + 1

    x = x_ref[...]                                   # (TM, S)   f32
    wc = wc_ref[...]                                 # (K, Cp)   f32

    # Convolution from static slices of the resident tile: for each output
    # time step l, contract the K-wide window against the conv weight and
    # fold into a running max (time-max fused into the conv loop, so the
    # (TM, L, Cp) intermediate never materializes).
    m_acc = None
    for l in range(L):                               # L, K are small & static
        conv_l = jnp.dot(x[:, l:l + K], wc,
                         preferred_element_type=jnp.float32)   # (TM, Cp)
        m_acc = conv_l if m_acc is None else jnp.maximum(m_acc, conv_l)

    # Bias + ReLU after the max: bias is constant over L and ReLU is monotone,
    # so this is exactly equivalent to relu(conv + b).max(L) but runs on
    # (TM, Cp) instead of (TM, L, Cp).
    x_max = jnp.maximum(m_acc + bc_ref[...], 0.0)    # (TM, Cp)

    # Fused highway matmul: [proj | gate] in a single lane-dense MXU pass.
    pg = jnp.dot(x_max, wpg_ref[...],
                 preferred_element_type=jnp.float32) + bpg_ref[...]  # (TM, 2Cp)
    proj = jnp.maximum(pg[:, :Cp], 0.0)
    gate = jax.nn.sigmoid(pg[:, Cp:])                # EUP

    # out = gate*proj + (1-gate)*x  ==  x + gate*(proj - x)
    out_ref[...] = x_max + gate * (proj - x_max)


def voice_cnn_forward(x, params, kernel_size, tile_m=256):
    """x: (B, N, S) float32 -> (B, N, C) float32."""
    wc, bc, wp, bp, wg, bg = params                  # PyTorch-shaped params
    B, N, S = x.shape
    K = kernel_size
    C = wc.shape[0]
    M = B * N

    LANE = 128
    Cp = _round_up(C, LANE)                          # lane-dense channel dim
    TM = min(tile_m, _round_up(M, 8))                # sublane-aligned row tile
    Mp = _round_up(M, TM)

    f32 = jnp.float32
    # Conv weight (C,1,K) -> (K, Cp); biases -> (1, Cp); highway weights
    # transposed to (in -> out) and fused into one (Cp, 2*Cp) matrix.
    # Zero padding keeps padded channels exactly zero through the whole net.
    wc_t = jnp.zeros((K, Cp), f32).at[:, :C].set(wc.reshape(C, K).T)
    bc_p = jnp.zeros((1, Cp), f32).at[:, :C].set(bc)
    wp_t = jnp.zeros((Cp, Cp), f32).at[:C, :C].set(wp.T)
    wg_t = jnp.zeros((Cp, Cp), f32).at[:C, :C].set(wg.T)
    wpg = jnp.concatenate([wp_t, wg_t], axis=1)                    # (Cp, 2Cp)
    bpg = jnp.concatenate(
        [jnp.zeros((1, Cp), f32).at[:, :C].set(bp),
         jnp.zeros((1, Cp), f32).at[:, :C].set(bg)], axis=1)       # (1, 2Cp)

    x2d = x.reshape(M, S).astype(f32)
    if Mp != M:
        x2d = jnp.zeros((Mp, S), f32).at[:M, :].set(x2d)

    grid = (Mp // TM,)

    out = pl.pallas_call(
        voice_cnn_kernel,
        out_shape=jax.ShapeDtypeStruct((Mp, Cp), jnp.float32),
        grid_spec=pltpu.PrefetchScalarGridSpec(
            num_scalar_prefetch=0,
            grid=grid,
            in_specs=[
                pl.BlockSpec((TM, S), lambda i: (i, 0)),        # row tile
                pl.BlockSpec((K, Cp), lambda i: (0, 0)),        # conv weight
                pl.BlockSpec((1, Cp), lambda i: (0, 0)),        # conv bias
                pl.BlockSpec((Cp, 2 * Cp), lambda i: (0, 0)),   # fused highway W
                pl.BlockSpec((1, 2 * Cp), lambda i: (0, 0)),    # fused highway b
            ],
            out_specs=pl.BlockSpec((TM, Cp), lambda i: (i, 0)),
        ),
        compiler_params=pltpu.CompilerParams(
            dimension_semantics=("parallel",),                  # 2 TCs on v7x
        ),
    )(x2d, wc_t, bc_p, wpg, bpg)

    # TODO(synk): optional bf16 cast of matmul operands for v6e/v7x MXU; kept
    # f32 here so the tight numerical check below holds on all generations.
    return out[:M, :C].reshape(B, N, C)


def init_params(key, output_channels, kernel_size):
    """Deterministic synthetic parameters with PyTorch-equivalent shapes."""
    C, K = output_channels, kernel_size
    ks = jax.random.split(key, 6)
    u = lambda k, shape, b: jax.random.uniform(k, shape, jnp.float32, -b, b)
    wc = u(ks[0], (C, 1, K), (1.0 / K) ** 0.5)       # Conv1d.weight (C_out, 1, K)
    bc = u(ks[1], (C,), (1.0 / K) ** 0.5)            # Conv1d.bias
    wp = u(ks[2], (C, C), (1.0 / C) ** 0.5)          # Highway proj Linear.weight
    bp = u(ks[3], (C,), (1.0 / C) ** 0.5)
    wg = u(ks[4], (C, C), (1.0 / C) ** 0.5)          # Highway gate Linear.weight
    bg = u(ks[5], (C,), (1.0 / C) ** 0.5)
    return wc, bc, wp, bp, wg, bg


def voice_cnn_reference(x, params, kernel_size):
    """Pure-JAX reference mirroring the PyTorch forward, for a sanity check."""
    wc, bc, wp, bp, wg, bg = params
    B, N, S = x.shape
    K = kernel_size
    C = wc.shape[0]
    L = S - K + 1
    outs = []
    for b in range(B):
        xb = x[b]                                     # (N, S)
        conv = jnp.stack(
            [xb[:, l:l + K] @ wc.reshape(C, K).T + bc for l in range(L)],
            axis=-1)                                  # (N, C, L)
        x_max = jnp.max(jnp.maximum(conv, 0.0), axis=-1)   # (N, C)
        proj = jnp.maximum(x_max @ wp.T + bp, 0.0)
        gate = jax.nn.sigmoid(x_max @ wg.T + bg)
        outs.append(gate * proj + (1.0 - gate) * x_max)
    return jnp.stack(outs)


if __name__ == "__main__":
    B, N, S = 2, 8, 16
    output_channels, kernel_size = 32, 5

    key = jax.random.PRNGKey(0)
    k_x, k_p = jax.random.split(key)
    x = jax.random.normal(k_x, (B, N, S), jnp.float32)
    params = init_params(k_p, output_channels, kernel_size)

    out = voice_cnn_forward(x, params, kernel_size)
    out = jax.block_until_ready(out)

    ref = voice_cnn_reference(x, params, kernel_size)
    assert out.shape == (B, N, output_channels)
    assert jnp.allclose(out, ref, atol=1e-4, rtol=1e-4), "mismatch vs reference"

    print("KERNEL_OK")
</pallas_src>

<mosaic_0001>
module attributes {stable_mosaic.version = 11 : i64} {
  func.func @voice_cnn_kernel(%arg0: i32, %arg1: memref<16x16xf32, #tpu.memory_space<vmem>>, %arg2: memref<5x128xf32, #tpu.memory_space<vmem>>, %arg3: memref<1x128xf32, #tpu.memory_space<vmem>>, %arg4: memref<128x256xf32, #tpu.memory_space<vmem>>, %arg5: memref<1x256xf32, #tpu.memory_space<vmem>>, %arg6: memref<16x128xf32, #tpu.memory_space<vmem>>) attributes {dimension_semantics = [#tpu.dimension_semantics<parallel>], iteration_bounds = array<i64: 1>, scalar_prefetch = 0 : i64, scratch_operands = 0 : i64, tpu.core_type = #tpu.core_type<tc>, window_params = [{transform_indices = @transform_0, window_bounds = array<i64: 16, 16>}, {pipeline_mode = #tpu.pipeline_mode<synchronous>, transform_indices = @transform_1, window_bounds = array<i64: 5, 128>}, {pipeline_mode = #tpu.pipeline_mode<synchronous>, transform_indices = @transform_2, window_bounds = array<i64: 1, 128>}, {pipeline_mode = #tpu.pipeline_mode<synchronous>, transform_indices = @transform_3, window_bounds = array<i64: 128, 256>}, {pipeline_mode = #tpu.pipeline_mode<synchronous>, transform_indices = @transform_4, window_bounds = array<i64: 1, 256>}, {transform_indices = @transform_5, window_bounds = array<i64: 16, 128>}]} {
    %c0 = arith.constant 0 : index
    %c0_0 = arith.constant 0 : index
    %0 = vector.load %arg1[%c0, %c0_0] : memref<16x16xf32, #tpu.memory_space<vmem>>, vector<16x16xf32>
    %c0_1 = arith.constant 0 : index
    %c0_2 = arith.constant 0 : index
    %1 = vector.load %arg2[%c0_1, %c0_2] : memref<5x128xf32, #tpu.memory_space<vmem>>, vector<5x128xf32>
    %2 = vector.extract_strided_slice %0 {offsets = [0, 0], sizes = [16, 5], strides = [1, 1]} : vector<16x16xf32> to vector<16x5xf32>
    %cst = arith.constant dense<0.000000e+00> : vector<16x128xf32>
    %3 = tpu.matmul %2, %1, %cst {dimension_numbers = #tpu.dot_dimension_numbers<[1], [0], [0], [1], [0, 0, 1, 1], [], []>} : vector<16x5xf32>, vector<5x128xf32>, vector<16x128xf32> -> vector<16x128xf32>
    %4 = vector.extract_strided_slice %0 {offsets = [0, 1], sizes = [16, 5], strides = [1, 1]} : vector<16x16xf32> to vector<16x5xf32>
    %cst_3 = arith.constant dense<0.000000e+00> : vector<16x128xf32>
    %5 = tpu.matmul %4, %1, %cst_3 {dimension_numbers = #tpu.dot_dimension_numbers<[1], [0], [0], [1], [0, 0, 1, 1], [], []>} : vector<16x5xf32>, vector<5x128xf32>, vector<16x128xf32> -> vector<16x128xf32>
    %6 = arith.maximumf %3, %5 : vector<16x128xf32>
    %7 = vector.extract_strided_slice %0 {offsets = [0, 2], sizes = [16, 5], strides = [1, 1]} : vector<16x16xf32> to vector<16x5xf32>
    %cst_4 = arith.constant dense<0.000000e+00> : vector<16x128xf32>
    %8 = tpu.matmul %7, %1, %cst_4 {dimension_numbers = #tpu.dot_dimension_numbers<[1], [0], [0], [1], [0, 0, 1, 1], [], []>} : vector<16x5xf32>, vector<5x128xf32>, vector<16x128xf32> -> vector<16x128xf32>
    %9 = arith.maximumf %6, %8 : vector<16x128xf32>
    %10 = vector.extract_strided_slice %0 {offsets = [0, 3], sizes = [16, 5], strides = [1, 1]} : vector<16x16xf32> to vector<16x5xf32>
    %cst_5 = arith.constant dense<0.000000e+00> : vector<16x128xf32>
    %11 = tpu.matmul %10, %1, %cst_5 {dimension_numbers = #tpu.dot_dimension_numbers<[1], [0], [0], [1], [0, 0, 1, 1], [], []>} : vector<16x5xf32>, vector<5x128xf32>, vector<16x128xf32> -> vector<16x128xf32>
    %12 = arith.maximumf %9, %11 : vector<16x128xf32>
    %13 = vector.extract_strided_slice %0 {offsets = [0, 4], sizes = [16, 5], strides = [1, 1]} : vector<16x16xf32> to vector<16x5xf32>
    %cst_6 = arith.constant dense<0.000000e+00> : vector<16x128xf32>
    %14 = tpu.matmul %13, %1, %cst_6 {dimension_numbers = #tpu.dot_dimension_numbers<[1], [0], [0], [1], [0, 0, 1, 1], [], []>} : vector<16x5xf32>, vector<5x128xf32>, vector<16x128xf32> -> vector<16x128xf32>
    %15 = arith.maximumf %12, %14 : vector<16x128xf32>
    %16 = vector.extract_strided_slice %0 {offsets = [0, 5], sizes = [16, 5], strides = [1, 1]} : vector<16x16xf32> to vector<16x5xf32>
    %cst_7 = arith.constant dense<0.000000e+00> : vector<16x128xf32>
    %17 = tpu.matmul %16, %1, %cst_7 {dimension_numbers = #tpu.dot_dimension_numbers<[1], [0], [0], [1], [0, 0, 1, 1], [], []>} : vector<16x5xf32>, vector<5x128xf32>, vector<16x128xf32> -> vector<16x128xf32>
    %18 = arith.maximumf %15, %17 : vector<16x128xf32>
    %19 = vector.extract_strided_slice %0 {offsets = [0, 6], sizes = [16, 5], strides = [1, 1]} : vector<16x16xf32> to vector<16x5xf32>
    %cst_8 = arith.constant dense<0.000000e+00> : vector<16x128xf32>
    %20 = tpu.matmul %19, %1, %cst_8 {dimension_numbers = #tpu.dot_dimension_numbers<[1], [0], [0], [1], [0, 0, 1, 1], [], []>} : vector<16x5xf32>, vector<5x128xf32>, vector<16x128xf32> -> vector<16x128xf32>
    %21 = arith.maximumf %18, %20 : vector<16x128xf32>
    %22 = vector.extract_strided_slice %0 {offsets = [0, 7], sizes = [16, 5], strides = [1, 1]} : vector<16x16xf32> to vector<16x5xf32>
    %cst_9 = arith.constant dense<0.000000e+00> : vector<16x128xf32>
    %23 = tpu.matmul %22, %1, %cst_9 {dimension_numbers = #tpu.dot_dimension_numbers<[1], [0], [0], [1], [0, 0, 1, 1], [], []>} : vector<16x5xf32>, vector<5x128xf32>, vector<16x128xf32> -> vector<16x128xf32>
    %24 = arith.maximumf %21, %23 : vector<16x128xf32>
    %25 = vector.extract_strided_slice %0 {offsets = [0, 8], sizes = [16, 5], strides = [1, 1]} : vector<16x16xf32> to vector<16x5xf32>
    %cst_10 = arith.constant dense<0.000000e+00> : vector<16x128xf32>
    %26 = tpu.matmul %25, %1, %cst_10 {dimension_numbers = #tpu.dot_dimension_numbers<[1], [0], [0], [1], [0, 0, 1, 1], [], []>} : vector<16x5xf32>, vector<5x128xf32>, vector<16x128xf32> -> vector<16x128xf32>
    %27 = arith.maximumf %24, %26 : vector<16x128xf32>
    %28 = vector.extract_strided_slice %0 {offsets = [0, 9], sizes = [16, 5], strides = [1, 1]} : vector<16x16xf32> to vector<16x5xf32>
    %cst_11 = arith.constant dense<0.000000e+00> : vector<16x128xf32>
    %29 = tpu.matmul %28, %1, %cst_11 {dimension_numbers = #tpu.dot_dimension_numbers<[1], [0], [0], [1], [0, 0, 1, 1], [], []>} : vector<16x5xf32>, vector<5x128xf32>, vector<16x128xf32> -> vector<16x128xf32>
    %30 = arith.maximumf %27, %29 : vector<16x128xf32>
    %31 = vector.extract_strided_slice %0 {offsets = [0, 10], sizes = [16, 5], strides = [1, 1]} : vector<16x16xf32> to vector<16x5xf32>
    %cst_12 = arith.constant dense<0.000000e+00> : vector<16x128xf32>
    %32 = tpu.matmul %31, %1, %cst_12 {dimension_numbers = #tpu.dot_dimension_numbers<[1], [0], [0], [1], [0, 0, 1, 1], [], []>} : vector<16x5xf32>, vector<5x128xf32>, vector<16x128xf32> -> vector<16x128xf32>
    %33 = arith.maximumf %30, %32 : vector<16x128xf32>
    %34 = vector.extract_strided_slice %0 {offsets = [0, 11], sizes = [16, 5], strides = [1, 1]} : vector<16x16xf32> to vector<16x5xf32>
    %cst_13 = arith.constant dense<0.000000e+00> : vector<16x128xf32>
    %35 = tpu.matmul %34, %1, %cst_13 {dimension_numbers = #tpu.dot_dimension_numbers<[1], [0], [0], [1], [0, 0, 1, 1], [], []>} : vector<16x5xf32>, vector<5x128xf32>, vector<16x128xf32> -> vector<16x128xf32>
    %36 = arith.maximumf %33, %35 : vector<16x128xf32>
    %c0_14 = arith.constant 0 : index
    %c0_15 = arith.constant 0 : index
    %37 = vector.load %arg3[%c0_14, %c0_15] : memref<1x128xf32, #tpu.memory_space<vmem>>, vector<1x128xf32>
    %38 = vector.broadcast %37 : vector<1x128xf32> to vector<16x128xf32>
    %39 = arith.addf %36, %38 : vector<16x128xf32>
    %cst_16 = arith.constant 0.000000e+00 : f32
    %40 = vector.broadcast %cst_16 : f32 to vector<16x128xf32>
    %41 = arith.maximumf %39, %40 : vector<16x128xf32>
    %c0_17 = arith.constant 0 : index
    %c0_18 = arith.constant 0 : index
    %42 = vector.load %arg4[%c0_17, %c0_18] : memref<128x256xf32, #tpu.memory_space<vmem>>, vector<128x256xf32>
    %cst_19 = arith.constant dense<0.000000e+00> : vector<16x256xf32>
    %43 = tpu.matmul %41, %42, %cst_19 {dimension_numbers = #tpu.dot_dimension_numbers<[1], [0], [0], [1], [0, 0, 1, 1], [], []>} : vector<16x128xf32>, vector<128x256xf32>, vector<16x256xf32> -> vector<16x256xf32>
    %c0_20 = arith.constant 0 : index
    %c0_21 = arith.constant 0 : index
    %44 = vector.load %arg5[%c0_20, %c0_21] : memref<1x256xf32, #tpu.memory_space<vmem>>, vector<1x256xf32>
    %45 = vector.broadcast %44 : vector<1x256xf32> to vector<16x256xf32>
    %46 = arith.addf %43, %45 : vector<16x256xf32>
    %47 = vector.extract_strided_slice %46 {offsets = [0, 0], sizes = [16, 128], strides = [1, 1]} : vector<16x256xf32> to vector<16x128xf32>
    %cst_22 = arith.constant 0.000000e+00 : f32
    %48 = vector.broadcast %cst_22 : f32 to vector<16x128xf32>
    %49 = arith.maximumf %47, %48 : vector<16x128xf32>
    %50 = vector.extract_strided_slice %46 {offsets = [0, 128], sizes = [16, 128], strides = [1, 1]} : vector<16x256xf32> to vector<16x128xf32>
    %51 = arith.negf %50 : vector<16x128xf32>
    %52 = math.exp %51 : vector<16x128xf32>
    %cst_23 = arith.constant 1.000000e+00 : f32
    %53 = vector.broadcast %cst_23 : f32 to vector<16x128xf32>
    %54 = arith.addf %53, %52 : vector<16x128xf32>
    %55 = arith.divf %53, %54 : vector<16x128xf32>
    %56 = arith.subf %49, %41 : vector<16x128xf32>
    %57 = arith.mulf %55, %56 : vector<16x128xf32>
    %58 = arith.addf %41, %57 : vector<16x128xf32>
    %c0_24 = arith.constant 0 : index
    %c0_25 = arith.constant 0 : index
    %59 = vector.load %arg6[%c0_24, %c0_25] : memref<16x128xf32, #tpu.memory_space<vmem>>, vector<16x128xf32>
    tpu.vector_store %arg6[%c0_24, %c0_25], %58 {strides = array<i32>} : memref<16x128xf32, #tpu.memory_space<vmem>>, vector<16x128xf32>,
    return
  }
  func.func @transform_0(%arg0: i32) -> (i32, i32) {
    %c0_i32 = arith.constant 0 : i32
    %c0_i32_0 = arith.constant 0 : i32
    return %arg0, %c0_i32 : i32, i32
  }
  func.func @transform_1(%arg0: i32) -> (i32, i32) {
    %c0_i32 = arith.constant 0 : i32
    %c0_i32_0 = arith.constant 0 : i32
    %c0_i32_1 = arith.constant 0 : i32
    return %c0_i32, %c0_i32_0 : i32, i32
  }
  func.func @transform_2(%arg0: i32) -> (i32, i32) {
    %c0_i32 = arith.constant 0 : i32
    %c0_i32_0 = arith.constant 0 : i32
    %c0_i32_1 = arith.constant 0 : i32
    return %c0_i32, %c0_i32_0 : i32, i32
  }
  func.func @transform_3(%arg0: i32) -> (i32, i32) {
    %c0_i32 = arith.constant 0 : i32
    %c0_i32_0 = arith.constant 0 : i32
    %c0_i32_1 = arith.constant 0 : i32
    return %c0_i32, %c0_i32_0 : i32, i32
  }
  func.func @transform_4(%arg0: i32) -> (i32, i32) {
    %c0_i32 = arith.constant 0 : i32
    %c0_i32_0 = arith.constant 0 : i32
    %c0_i32_1 = arith.constant 0 : i32
    return %c0_i32, %c0_i32_0 : i32, i32
  }
  func.func @transform_5(%arg0: i32) -> (i32, i32) {
    %c0_i32 = arith.constant 0 : i32
    %c0_i32_0 = arith.constant 0 : i32
    return %arg0, %c0_i32 : i32, i32
  }
}

</mosaic_0001>

<bundles_post_ra>
// kernel: tpu_custom_call.1
= control target key start
LH: loop header
LB: loop body
LE: loop exit
PB: predicated region body
PF: predicated region fallthrough
CT: control target
= control target key end

     0   :  { %10 = vsyncpa [#allocation3], 0  ;;  %s1653_s0 = inlined_call_operand.hbm [shape: f32[16,16], index: 0, kind: input, shape index: {}]   ;;  %s1654_s1 = inlined_call_operand.hbm [shape: f32[5,128], index: 1, kind: input, shape index: {}]   ;;  %s1655_s2 = inlined_call_operand.vmem [shape: f32[1,128], index: 2, kind: input, shape index: {}]   ;;  %s1656_s3 = inlined_call_operand.hbm [shape: f32[128,256], index: 3, kind: input, shape index: {}]   ;;  %s1657_s4 = inlined_call_operand.vmem [shape: f32[1,256], index: 4, kind: input, shape index: {}]   ;;  %s1658_s5 = inlined_call_operand.hbm [shape: f32[16,128], index: 5, kind: output, shape index: {}]  }
   0x1   :  { %11 = vsyncpa [#allocation6], 0 }
   0x2   :  { %12 = vsyncpa [#allocation4], 0  ;;  %s1505_s18 = smov [#allocation5]   ;;  %s1506_s20 = smov [#allocation2]  }
   0x3   :  { %s31_s19 = sshll.u32 %s1505_s18, 4  ;;  %s18_s21 = sshll.u32 %s1506_s20, 4  ;;  %s32_s19 = int_to_ptr.vmem [resolvable:$true] %s31_s19  ;;  %s19_s21 = int_to_ptr.vmem [resolvable:$true] %s18_s21 }
   0x4   :  { %s1427_s22 = scalar_lea.vmem %s32_s19, 128  ;;  %p1432_p1 = scmp.lt.s32.totalorder %s32_s19, %s32_s19 }
   0x5   :  { %p1428_p0 = scmp.ne.s32.totalorder %s32_s19, %s1427_s22  ;;  %p1433_p2 = scmp.lt.s32.totalorder %s1427_s22, %s1427_s22 }
   0x7   :  { %p1434_p3 = por %p1433_p2, %p1432_p1 }
   0x9   :  { %p1435_p4 = pnand %p1434_p3, %p1428_p0 }
   0xb   :  { %1438 = shalt.err (!%p1435_p4)
}
   0xc   :  { %34 = dma.hbm_to_vmem [thread:$0]  %s1654_s1, 128, %s32_s19, [#allocation6]  }
   0xd   :  { %s1447_s25 = scalar_lea.vmem %s19_s21, 256  ;;  %p1452_p6 = scmp.lt.s32.totalorder %s19_s21, %s19_s21 }
   0xe   :  { %p1448_p5 = scmp.ne.s32.totalorder %s19_s21, %s1447_s25  ;;  %p1453_p7 = scmp.lt.s32.totalorder %s1447_s25, %s1447_s25 }
  0x10   :  { %p1454_p8 = por %p1453_p7, %p1452_p6 }
  0x12   :  { %p1455_p9 = pnand %p1454_p8, %p1448_p5 }
  0x14   :  { %1458 = shalt.err (!%p1455_p9)
}
  0x15   :  { %s1507_s26 = smov 128   ;;  %s1508_s27 = smov 8  }
  0x16   :  { %24 = dma.hbm_to_vmem [thread:$0]  %s1653_s0, 256, %s19_s21, [#allocation3], %s1507_s26, %s1507_s26, %s1508_s27  }
  0x17   :  { %s1509_s30 = smov [#allocation7]  }
  0x18   :  { %s42_s6 = sshll.u32 %s1509_s30, 4  ;;  %s43_s6 = int_to_ptr.vmem [resolvable:$true] %s42_s6 }
  0x19   :  { %s1467_s1 = scalar_lea.vmem %s43_s6, 4096  ;;  %p1472_p11 = scmp.lt.s32.totalorder %s43_s6, %s43_s6 }
  0x1a   :  { %p1468_p10 = scmp.ne.s32.totalorder %s43_s6, %s1467_s1  ;;  %p1473_p12 = scmp.lt.s32.totalorder %s1467_s1, %s1467_s1 }
  0x1c   :  { %p1474_p13 = por %p1473_p12, %p1472_p11 }
  0x1e   :  { %p1475_p0 = pnand %p1474_p13, %p1468_p10 }
  0x20   :  { %1478 = shalt.err (!%p1475_p0)
}
  0x21   :  { %s1510_s7 = smov 256   ;;  %s1511_s8 = smov 16  }
  0x22   :  { %48 = dma.hbm_to_vmem [thread:$0]  %s1656_s3, 4096, %s43_s6, [#allocation6], %s1510_s7, %s1510_s7, %s1511_s8  }
  0x23   :  { %1499 = dma.done.wait [#allocation3], 256  }
  0x24   :  { %1500 = vsyncadd [#allocation3], 4294967040 }
  0x25   :  { %1501 = dma.done.wait [#allocation6], 4224  }
  0x26   :  { %1502 = vsyncadd [#allocation6], 4294963072  ;;  %vm70_vm0 = vcmask 1044480   ;;  %vm63_vm1 = vcmask 39936   ;;  %v60_v0 = vld [vmem:[#allocation2] sm:$0xff]  ;;  %s1512_s0 = smov 127  }
  0x27   :  { %v1567_v1 = vld [vmem:[#allocation5] sm:$0x1f]  ;;  %149 = vrot.lane.b32.xlu0 %v60_v0, %s1512_s0  ;;  %s1513_s11 = smov 126   ;;  %v61_v2 = vld [vmem:[#allocation2 + $0x8] sm:$0xff]  ;;  %1333 = vmatprep.mubr.msk.f32.mxu1 %vm63_vm1, %v60_v0  ;;  %s1514_s3 = smov 125   ;;  %v1124_v27 = vld [vmem:[#allocation7 + $0xe8] sm:$0xff] }
  0x28   :  { %234 = vrot.lane.b32.xlu1 %v60_v0, %s1513_s11  ;;  %1331 = vmatprep.subr.msk.mxu1 %vm70_vm0, %v1567_v1  ;;  %s1515_s12 = smov 124   ;;  %s1516_s13 = smov 123   ;;  %v1126_v25 = vld [vmem:[#allocation7 + $0xf8] sm:$0xff]  ;;  %v1125_v26 = vld [vmem:[#allocation7 + $0xf0] sm:$0xff]  ;;  %v1123_v28 = vld [vmem:[#allocation7 + $0xe0] sm:$0xff]  ;;  %v1523_v57 = vmov 0.0  }
  0x29   :  { %1332 = vmatpush3.msk.msra.mxu1 %vm70_vm0, %v1567_v1  ;;  %1371 = vmatprep.subr.msk.mxu0 %vm70_vm0, %v1567_v1  ;;  %s1517_s14 = smov 122   ;;  %s1518_s15 = smov 121   ;;  %v1122_v29 = vld [vmem:[#allocation7 + $0xd8] sm:$0xff]  ;;  %v1121_v30 = vld [vmem:[#allocation7 + $0xd0] sm:$0xff]  ;;  %v1120_v31 = vld [vmem:[#allocation7 + $0xc8] sm:$0xff] }
  0x2a   :  { %1334 = vmatmul.mubr.msk.f32.vlgmr.msra.gmra.mxu1 %vm63_vm1, %v61_v2  ;;  %1336 = vmatprep.subr.msk.mxu1 %vm70_vm0, %v1567_v1  ;;  %s1519_s16 = smov 120   ;;  %s1520_s17 = smov 119   ;;  %v1119_v32 = vld [vmem:[#allocation7 + $0xc0] sm:$0xff]  ;;  %v1118_v33 = vld [vmem:[#allocation7 + $0xb8] sm:$0xff]  ;;  %v1117_v34 = vld [vmem:[#allocation7 + $0xb0] sm:$0xff] }
  0x2b   :  { %151 = vrot.lane.b32.xlu0 %v61_v2, %s1512_s0  ;;  %1337 = vmatpush3.msk.msra.mxu1 %vm70_vm0, %v1567_v1  ;;  %s1521_s18 = smov 118   ;;  %s1522_s19 = smov 117   ;;  %v1116_v35 = vld [vmem:[#allocation7 + $0xa8] sm:$0xff]  ;;  %v1115_v36 = vld [vmem:[#allocation7 + $0xa0] sm:$0xff]  ;;  %v1114_v37 = vld [vmem:[#allocation7 + $0x98] sm:$0xff] }
  0x2c   :  { %236 = vrot.lane.b32.xlu1 %v61_v2, %s1513_s11  ;;  %1372 = vmatpush3.msk.msra.mxu0 %vm70_vm0, %v1567_v1  ;;  %v1113_v38 = vld [vmem:[#allocation7 + $0x90] sm:$0xff]  ;;  %v1112_v39 = vld [vmem:[#allocation7 + $0x88] sm:$0xff]  ;;  %v1111_v40 = vld [vmem:[#allocation7 + $0x80] sm:$0xff] }
  0x2d   :  { %1341 = vmatprep.subr.msk.mxu1 %vm70_vm0, %v1567_v1  ;;  %1381 = vmatprep.subr.msk.mxu0 %vm70_vm0, %v1567_v1  ;;  %v1110_v41 = vld [vmem:[#allocation7 + $0x78] sm:$0xff]  ;;  %v1109_v42 = vld [vmem:[#allocation7 + $0x70] sm:$0xff]  ;;  %v1108_v43 = vld [vmem:[#allocation7 + $0x68] sm:$0xff] }
  0x2e   :  { %v1107_v44 = vld [vmem:[#allocation7 + $0x60] sm:$0xff]  ;;  %v1106_v45 = vld [vmem:[#allocation7 + $0x58] sm:$0xff]  ;;  %v1105_v46 = vld [vmem:[#allocation7 + $0x50] sm:$0xff] }
  0x2f   :  { %319 = vrot.lane.b32.xlu0 %v60_v0, %s1514_s3  ;;  %v1104_v47 = vld [vmem:[#allocation7 + $0x48] sm:$0xff]  ;;  %v1103_v48 = vld [vmem:[#allocation7 + $0x40] sm:$0xff]  ;;  %v1102_v49 = vld [vmem:[#allocation7 + $0x38] sm:$0xff] }
  0x30   :  { %321 = vrot.lane.b32.xlu1 %v61_v2, %s1514_s3  ;;  %v1101_v50 = vld [vmem:[#allocation7 + $0x30] sm:$0xff]  ;;  %v1100_v51 = vld [vmem:[#allocation7 + $0x28] sm:$0xff]  ;;  %v1099_v52 = vld [vmem:[#allocation7 + $0x20] sm:$0xff] }
  0x31   :  { %v1098_v53 = vld [vmem:[#allocation7 + $0x18] sm:$0xff]  ;;  %v1097_v54 = vld [vmem:[#allocation7 + $0x10] sm:$0xff]  ;;  %v1096_v55 = vld [vmem:[#allocation7 + $0x8] sm:$0xff] }
  0x32   :  { %v1095_v56 = vld [vmem:[#allocation7] sm:$0xff] }
  0x33   :  { %404 = vrot.lane.b32.xlu0 %v60_v0, %s1515_s12 }
  0x34   :  { %406 = vrot.lane.b32.xlu1 %v61_v2, %s1515_s12 }
  0x37   :  { %489 = vrot.lane.b32.xlu0 %v60_v0, %s1516_s13 }
  0x38   :  { %491 = vrot.lane.b32.xlu1 %v61_v2, %s1516_s13 }
  0x3b   :  { %574 = vrot.lane.b32.xlu0 %v60_v0, %s1517_s14 }
  0x3c   :  { %576 = vrot.lane.b32.xlu1 %v61_v2, %s1517_s14 }
  0x3f   :  { %659 = vrot.lane.b32.xlu0 %v60_v0, %s1518_s15 }
  0x40   :  { %661 = vrot.lane.b32.xlu1 %v61_v2, %s1518_s15 }
  0x43   :  { %744 = vrot.lane.b32.xlu0 %v60_v0, %s1519_s16 }
  0x44   :  { %746 = vrot.lane.b32.xlu1 %v61_v2, %s1519_s16 }
  0x47   :  { %829 = vrot.lane.b32.xlu0 %v60_v0, %s1520_s17 }
  0x48   :  { %831 = vrot.lane.b32.xlu1 %v61_v2, %s1520_s17 }
  0x4b   :  { %914 = vrot.lane.b32.xlu0 %v60_v0, %s1521_s18 }
  0x4c   :  { %916 = vrot.lane.b32.xlu1 %v61_v2, %s1521_s18 }
  0x4f   :  { %999 = vrot.lane.b32.xlu0 %v60_v0, %s1522_s19 }
  0x50   :  { %1001 = vrot.lane.b32.xlu1 %v61_v2, %s1522_s19 }
  0x99   :  { %v150_v3 = vpop.permute.xlu0 %149 }
  0x9a   :  { %v235_v4 = vpop.permute.xlu1 %234  ;;  %1338 = vmatprep.mubr.msk.f32.mxu1 %vm63_vm1, %v150_v3 }
  0x9d   :  { %v152_v5 = vpop.permute.xlu0 %151 }
  0x9e   :  { %v237_v6 = vpop.permute.xlu1 %236  ;;  %1339 = vmatmul.mubr.msk.f32.vlgmr.msra.gmra.mxu1 %vm63_vm1, %v152_v5 }
  0x9f   :  { %1343 = vmatprep.mubr.msk.f32.mxu1 %vm63_vm1, %v235_v4  ;;  %1342 = vmatpush3.msk.msra.mxu1 %vm70_vm0, %v1567_v1 }
  0xa0   :  { %1346 = vmatprep.subr.msk.mxu1 %vm70_vm0, %v1567_v1 }
  0xa1   :  { %v320_v7 = vpop.permute.xlu0 %319 }
  0xa2   :  { %v322_v8 = vpop.permute.xlu1 %321  ;;  %1344 = vmatmul.mubr.msk.f32.vlgmr.msra.gmra.mxu1 %vm63_vm1, %v237_v6 }
  0xa3   :  { %1348 = vmatprep.mubr.msk.f32.mxu1 %vm63_vm1, %v320_v7  ;;  %1347 = vmatpush3.msk.msra.mxu1 %vm70_vm0, %v1567_v1 }
  0xa4   :  { %1351 = vmatprep.subr.msk.mxu1 %vm70_vm0, %v1567_v1 }
  0xa5   :  { %v405_v9 = vpop.permute.xlu0 %404 }
  0xa6   :  { %v407_v10 = vpop.permute.xlu1 %406  ;;  %1349 = vmatmul.mubr.msk.f32.vlgmr.msra.gmra.mxu1 %vm63_vm1, %v322_v8 }
  0xa7   :  { %1353 = vmatprep.mubr.msk.f32.mxu1 %vm63_vm1, %v405_v9  ;;  %1352 = vmatpush3.msk.msra.mxu1 %vm70_vm0, %v1567_v1 }
  0xa8   :  { %1356 = vmatprep.subr.msk.mxu1 %vm70_vm0, %v1567_v1 }
  0xa9   :  { %v490_v11 = vpop.permute.xlu0 %489 }
  0xaa   :  { %v492_v12 = vpop.permute.xlu1 %491  ;;  %1354 = vmatmul.mubr.msk.f32.vlgmr.msra.gmra.mxu1 %vm63_vm1, %v407_v10 }
  0xab   :  { %1358 = vmatprep.mubr.msk.f32.mxu1 %vm63_vm1, %v490_v11  ;;  %1357 = vmatpush3.msk.msra.mxu1 %vm70_vm0, %v1567_v1 }
  0xac   :  { %1361 = vmatprep.subr.msk.mxu1 %vm70_vm0, %v1567_v1 }
  0xad   :  { %v575_v13 = vpop.permute.xlu0 %574 }
  0xae   :  { %v577_v14 = vpop.permute.xlu1 %576  ;;  %1359 = vmatmul.mubr.msk.f32.vlgmr.msra.gmra.mxu1 %vm63_vm1, %v492_v12 }
  0xaf   :  { %1363 = vmatprep.mubr.msk.f32.mxu1 %vm63_vm1, %v575_v13  ;;  %1362 = vmatpush3.msk.msra.mxu1 %vm70_vm0, %v1567_v1 }
  0xb0   :  { %1366 = vmatprep.subr.msk.mxu1 %vm70_vm0, %v1567_v1 }
  0xb1   :  { %v660_v15 = vpop.permute.xlu0 %659 }
  0xb2   :  { %v662_v16 = vpop.permute.xlu1 %661  ;;  %1364 = vmatmul.mubr.msk.f32.vlgmr.msra.gmra.mxu1 %vm63_vm1, %v577_v14 }
  0xb3   :  { %1368 = vmatprep.mubr.msk.f32.mxu1 %vm63_vm1, %v660_v15  ;;  %1367 = vmatpush3.msk.msra.mxu1 %vm70_vm0, %v1567_v1 }
  0xb4   :  { %1376 = vmatprep.subr.msk.mxu1 %vm70_vm0, %v1567_v1 }
  0xb5   :  { %v745_v17 = vpop.permute.xlu0 %744 }
  0xb6   :  { %v747_v18 = vpop.permute.xlu1 %746  ;;  %1369 = vmatmul.mubr.msk.f32.vlgmr.msra.gmra.mxu1 %vm63_vm1, %v662_v16  ;;  %1373 = vmatprep.mubr.msk.f32.mxu0 %vm63_vm1, %v745_v17 }
  0xb7   :  { %1374 = vmatmul.mubr.msk.f32.vlgmr.msra.gmra.mxu0 %vm63_vm1, %v747_v18  ;;  %1377 = vmatpush3.msk.msra.mxu1 %vm70_vm0, %v1567_v1 }
  0xb8   :  { %1382 = vmatpush3.msk.msra.mxu0 %vm70_vm0, %v1567_v1  ;;  %1386 = vmatprep.subr.msk.mxu1 %vm70_vm0, %v1567_v1 }
  0xb9   :  { %v830_v19 = vpop.permute.xlu0 %829  ;;  %1139 = vmatprep.subr.mxu0 %v1126_v25 }
  0xba   :  { %v832_v20 = vpop.permute.xlu1 %831  ;;  %1378 = vmatprep.mubr.msk.f32.mxu1 %vm63_vm1, %v830_v19 }
  0xbb   :  { %1379 = vmatmul.mubr.msk.f32.vlgmr.msra.gmra.mxu1 %vm63_vm1, %v832_v20 }
  0xbc   :  { %1387 = vmatpush3.msk.msra.mxu1 %vm70_vm0, %v1567_v1 }
  0xbd   :  { %v915_v21 = vpop.permute.xlu0 %914 }
  0xbe   :  { %v917_v22 = vpop.permute.xlu1 %916  ;;  %1383 = vmatprep.mubr.msk.f32.mxu0 %vm63_vm1, %v915_v21 }
  0xbf   :  { %1384 = vmatmul.mubr.msk.f32.vlgmr.msra.gmra.mxu0 %vm63_vm1, %v917_v22 }
  0xc0   :  { %1140 = vmatpush1.msra.mxu0 %v1125_v26  ;;  %1203 = vmatprep.mubr.f32.mxu0 %v1523_v57 }
  0xc1   :  { %v1000_v23 = vpop.permute.xlu0 %999  ;;  %1141 = vmatprep.subr.mxu0 %v1124_v27 }
  0xc2   :  { %v1002_v24 = vpop.permute.xlu1 %1001  ;;  %1388 = vmatprep.mubr.msk.f32.mxu1 %vm63_vm1, %v1000_v23  ;;  %1142 = vmatpush1.msra.mxu0 %v1123_v28 }
  0xc3   :  { %1389 = vmatmul.mubr.msk.f32.vlgmr.msra.gmra.mxu1 %vm63_vm1, %v1002_v24  ;;  %1143 = vmatprep.subr.mxu0 %v1122_v29 }
  0xc4   :  { %1144 = vmatpush1.msra.mxu0 %v1121_v30 }
  0xc5   :  { %1145 = vmatprep.subr.mxu0 %v1120_v31 }
  0xc6   :  { %1146 = vmatpush1.msra.mxu0 %v1119_v32 }
  0xc7   :  { %1147 = vmatprep.subr.mxu0 %v1118_v33 }
  0xc8   :  { %1148 = vmatpush1.msra.mxu0 %v1117_v34 }
  0xc9   :  { %1149 = vmatprep.subr.mxu0 %v1116_v35 }
  0xca   :  { %1150 = vmatpush1.msra.mxu0 %v1115_v36 }
  0xcb   :  { %1151 = vmatprep.subr.mxu0 %v1114_v37 }
  0xcc   :  { %1152 = vmatpush1.msra.mxu0 %v1113_v38 }
  0xcd   :  { %1153 = vmatprep.subr.mxu0 %v1112_v39 }
  0xce   :  { %1154 = vmatpush1.msra.mxu0 %v1111_v40  ;;  %v1292_v40 = vld [vmem:[%s1655_s2] ss:$0 sm:$0xff]  ;;  %s1524_s2 = smov [#allocation8]  }
  0xcf   :  { %1155 = vmatprep.subr.mxu0 %v1110_v41 }
  0xd0   :  { %1156 = vmatpush1.msra.mxu0 %v1109_v42 }
  0xd1   :  { %1157 = vmatprep.subr.mxu0 %v1108_v43 }
  0xd2   :  { %1158 = vmatpush1.msra.mxu0 %v1107_v44 }
  0xd3   :  { %1159 = vmatprep.subr.mxu0 %v1106_v45  ;;  %v1129_v45 = vlaneseq }
  0xd4   :  { %1160 = vmatpush1.msra.mxu0 %v1105_v46 }
  0xd5   :  { %1161 = vmatprep.subr.mxu0 %v1104_v47  ;;  %v1130_v46 = vshrl.u32 %v1129_v45, 7 }
  0xd6   :  { %1162 = vmatpush1.msra.mxu0 %v1103_v48  ;;  %v1127_v48 = vld [vmem:[%s1657_s4] sm:$0x3]  ;;  %s1243_s4 = sshll.u32 %s1524_s2, 4  ;;  %s1244_s4 = int_to_ptr.vmem [resolvable:$true] %s1243_s4 }
  0xd7   :  { %1163 = vmatprep.subr.mxu0 %v1102_v49  ;;  %v1135_v47 = vsub.s32 1, %v1130_v46  ;;  %s1479_s24 = scalar_lea.vmem %s1244_s4, 256  ;;  %p1484_p2 = scmp.lt.s32.totalorder %s1244_s4, %s1244_s4 }
  0xd8   :  { %1164 = vmatpush1.msra.mxu0 %v1101_v50  ;;  %p1480_p1 = scmp.ne.s32.totalorder %s1244_s4, %s1479_s24  ;;  %p1485_p3 = scmp.lt.s32.totalorder %s1479_s24, %s1479_s24 }
  0xd9   :  { %1165 = vmatprep.subr.mxu0 %v1100_v51  ;;  %v1136_v49 = vrot.slane %v1127_v48, %v1135_v47 }
  0xda   :  { %1166 = vmatpush1.msra.mxu0 %v1099_v52  ;;  %p1486_p4 = por %p1485_p3, %p1484_p2 }
  0xdb   :  { %1167 = vmatprep.subr.mxu0 %v1098_v53 }
  0xdc   :  { %1168 = vmatpush1.msra.mxu0 %v1097_v54  ;;  %p1487_p5 = pnand %p1486_p4, %p1480_p1 }
  0xdd   :  { %1169 = vmatprep.subr.mxu0 %v1096_v55 }
  0xde   :  { %1170 = vmatpush1.msra.mxu0 %v1095_v56 }
  0xea   :  { %v1335_v58 = vpop.f32.mrf.mxu1 }
  0xec   :  { %v140_v59 = vpop.f32.mrf.mxu1 }
 0x15e   :  { %v1340_v60 = vpop.f32.mrf.mxu1 }
 0x15f   :  { %v233_v4 = vmax.f32 %v1335_v58, %v1340_v60 }
 0x160   :  { %v223_v61 = vpop.f32.mrf.mxu1 }
 0x161   :  { %v232_v5 = vmax.f32 %v140_v59, %v223_v61 }
 0x162   :  { %v1345_v62 = vpop.f32.mrf.mxu1 }
 0x163   :  { %v318_v7 = vmax.f32 %v233_v4, %v1345_v62 }
 0x164   :  { %v308_v63 = vpop.f32.mrf.mxu1 }
 0x165   :  { %v317_v8 = vmax.f32 %v232_v5, %v308_v63 }
 0x166   :  { %v1350_v0 = vpop.f32.mrf.mxu1 }
 0x167   :  { %v403_v10 = vmax.f32 %v318_v7, %v1350_v0 }
 0x168   :  { %v393_v1 = vpop.f32.mrf.mxu1 }
 0x169   :  { %v402_v11 = vmax.f32 %v317_v8, %v393_v1 }
 0x16a   :  { %v1355_v2 = vpop.f32.mrf.mxu1 }
 0x16b   :  { %v488_v13 = vmax.f32 %v403_v10, %v1355_v2 }
 0x16c   :  { %v478_v3 = vpop.f32.mrf.mxu1 }
 0x16d   :  { %v487_v14 = vmax.f32 %v402_v11, %v478_v3 }
 0x16e   :  { %v1360_v6 = vpop.f32.mrf.mxu1 }
 0x16f   :  { %v573_v16 = vmax.f32 %v488_v13, %v1360_v6 }
 0x170   :  { %v563_v9 = vpop.f32.mrf.mxu1 }
 0x171   :  { %v572_v17 = vmax.f32 %v487_v14, %v563_v9 }
 0x172   :  { %v1365_v12 = vpop.f32.mrf.mxu1 }
 0x173   :  { %v658_v20 = vmax.f32 %v573_v16, %v1365_v12 }
 0x174   :  { %v648_v15 = vpop.f32.mrf.mxu1 }
 0x175   :  { %v657_v21 = vmax.f32 %v572_v17, %v648_v15 }
 0x176   :  { %v1370_v18 = vpop.f32.mrf.mxu1 }
 0x177   :  { %v1375_v19 = vpop.f32.mrf.mxu0  ;;  %v743_v23 = vmax.f32 %v658_v20, %v1370_v18 }
 0x178   :  { %v733_v22 = vpop.f32.mrf.mxu1 }
 0x179   :  { %v742_v24 = vmax.f32 %v657_v21, %v733_v22  ;;  %v818_v25 = vpop.f32.mrf.mxu0  ;;  %v828_v27 = vmax.f32 %v743_v23, %v1375_v19 }
 0x17b   :  { %v1380_v26 = vpop.f32.mrf.mxu1  ;;  %v827_v28 = vmax.f32 %v742_v24, %v818_v25 }
 0x17c   :  { %v913_v32 = vmax.f32 %v828_v27, %v1380_v26 }
 0x17d   :  { %v903_v29 = vpop.f32.mrf.mxu1 }
 0x17e   :  { %v912_v33 = vmax.f32 %v827_v28, %v903_v29 }
 0x17f   :  { %v1385_v30 = vpop.f32.mrf.mxu0 }
 0x180   :  { %v998_v35 = vmax.f32 %v913_v32, %v1385_v30 }
 0x181   :  { %v988_v31 = vpop.f32.mrf.mxu0 }
 0x182   :  { %v997_v36 = vmax.f32 %v912_v33, %v988_v31 }
 0x183   :  { %v1390_v34 = vpop.f32.mrf.mxu1 }
 0x184   :  { %v1083_v38 = vmax.f32 %v998_v35, %v1390_v34 }
 0x185   :  { %v1073_v37 = vpop.f32.mrf.mxu1 }
 0x186   :  { %v1082_v39 = vmax.f32 %v997_v36, %v1073_v37  ;;  %v1092_v42 = vadd.f32 %v1292_v40, %v1083_v38 }
 0x188   :  { %v1091_v41 = vadd.f32 %v1292_v40, %v1082_v39  ;;  %v1094_v44 = vmax.f32 %v1092_v42, 0.0 }
 0x18a   :  { %v1093_v43 = vmax.f32 %v1091_v41, 0.0 }
 0x18c   :  { %1204 = vmatmul.mubr.f32.vlgmr.msra.gmra.mxu0 %v1093_v43 }
 0x18d   :  { %1209 = vmatprep.mubr.f32.mxu0 %v1523_v57  ;;  %v1131_v57 = vsub.s32 0, %v1130_v46 }
 0x18f   :  { %v1132_v61 = vrot.slane %v1127_v48, %v1131_v57 }
 0x190   :  { %1210 = vmatmul.mubr.f32.gmra.mxu0 %v1094_v44 }
 0x24c   :  { %v1205_v50 = vpop.f32.mrf.mxu0 }
 0x24d   :  { %v1206_v0 = vadd.f32 %v1205_v50, %v1132_v61 }
 0x24e   :  { %v1207_v51 = vpop.f32.mrf.mxu0 }
 0x24f   :  { %v1208_v52 = vadd.f32 %v1207_v51, %v1136_v49  ;;  %v1216_v1 = vmax.f32 %v1206_v0, 0.0 }
 0x250   :  { %v1211_v53 = vpop.f32.mrf.mxu0 }
 0x251   :  { %v1293_v54 = vmul.f32 -1.442695, %v1208_v52  ;;  %v1212_v2 = vadd.f32 %v1211_v53, %v1132_v61  ;;  %v1230_v3 = vsub.f32 %v1216_v1, %v1093_v43 }
 0x252   :  { %v1213_v55 = vpop.f32.mrf.mxu0 }
 0x253   :  { %1411 = vpow2.f32 %v1293_v54  ;;  %v1214_v56 = vadd.f32 %v1213_v55, %v1136_v49  ;;  %v1217_v4 = vmax.f32 %v1212_v2, 0.0 }
 0x255   :  { %v1294_v58 = vmul.f32 -1.442695, %v1214_v56  ;;  %v1231_v7 = vsub.f32 %v1217_v4, %v1094_v44 }
 0x257   :  { %1413 = vpow2.f32 %v1294_v58 }
 0x260   :  { %v1412_v59 = vpop.eup %1411 }
 0x261   :  { %v1224_v60 = vadd.f32 1.0, %v1412_v59 }
 0x263   :  { %1415 = vrcp.f32 %v1224_v60 }
 0x264   :  { %v1414_v62 = vpop.eup %1413 }
 0x265   :  { %v1225_v63 = vadd.f32 1.0, %v1414_v62 }
 0x267   :  { %1417 = vrcp.f32 %v1225_v63 }
 0x270   :  { %v1416_v5 = vpop.eup %1415 }
 0x271   :  { %v1232_v6 = vmul.f32 %v1416_v5, %v1230_v3 }
 0x273   :  { %v1234_v8 = vadd.f32 %v1232_v6, %v1093_v43 }
 0x274   :  { %v1418_v9 = vpop.eup %1417 }
 0x275   :  { %v1233_v10 = vmul.f32 %v1418_v9, %v1231_v7  ;;  %1236 = vst [vmem:[#allocation8] sm:$0xff] %v1234_v8 }
 0x277   :  { %v1235_v11 = vadd.f32 %v1233_v10, %v1094_v44 }
 0x279   :  { %1237 = vst [vmem:[#allocation8 + $0x8] sm:$0xff] %v1235_v11 }
 0x27a   :  { %1490 = shalt.err (!%p1487_p5)
}
 0x27b   :  { %1249 = dma.vmem_to_hbm [thread:$0]  %s1244_s4, 256, %s1658_s5, [#allocation4], %s1507_s26, %s1507_s26, %s1508_s27  }
 0x27c   :  { %1503 = dma.done.wait [#allocation4], 256  }
 0x27d   :  { %1504 = vsyncadd [#allocation4], 4294967040 }
 0x27e   :  { %1253 = vsyncpa [#allocation3], 1 }
 0x27f   :  { %1254 = vsyncpa [#allocation6], 1 }
 0x280   :  { %1255 = vsyncpa [#allocation4], 1 }

</bundles_post_ra>
